<compile_context>
chip_gen: v5e
topology: v5e:2x2
jax: 0.10.0
libtpu: 0.0.40
codegen_flags: <defaults>
</compile_context>

<pallas_src>
import functools

import jax
import jax.numpy as jnp
from jax.experimental import pallas as pl
from jax.experimental.pallas import tpu as pltpu  # noqa: F401  (kept for TPU-specific tuning hooks)


def _softplus(x):
    # numerically-stable softplus, matches F.softplus(beta=1) for these magnitudes
    return jnp.maximum(x, 0.0) + jnp.log1p(jnp.exp(-jnp.abs(x)))


def _focal_decoder_kernel(num_layers, *refs):
    """Fused forward for every (decoder, ensemble-member) pair.

    refs = [x,
            W0, b0, ..., W_{L-1}, b_{L-1},        # packed hidden layers
            W_mean, b_mean, W_logvar, b_logvar,   # packed heads (lane-aligned slots)
            min_lv, max_lv,
            mean_out, logvar_out]
    Weights are bf16, biases/bounds f32; matmuls accumulate in f32.
    """
    x_ref = refs[0]
    idx = 1
    h = x_ref[...]                                            # (B, D_in) bf16
    for _ in range(num_layers):
        w = refs[idx][...]                                    # bf16 (in, H_tot)
        b = refs[idx + 1][...]                                # f32  (1, H_tot)
        idx += 2
        acc = jnp.dot(h, w, preferred_element_type=jnp.float32) + b
        h = jnp.maximum(acc, 0.0).astype(jnp.bfloat16)        # ReLU, back to bf16 for MXU

    w_mean = refs[idx][...]
    b_mean = refs[idx + 1][...]
    w_lv = refs[idx + 2][...]
    b_lv = refs[idx + 3][...]
    min_lv = refs[idx + 4][...]
    max_lv = refs[idx + 5][...]
    mean_ref = refs[idx + 6]
    logvar_ref = refs[idx + 7]

    mean = jnp.dot(h, w_mean, preferred_element_type=jnp.float32) + b_mean   # (B, OUT_TOT) f32
    lv = jnp.dot(h, w_lv, preferred_element_type=jnp.float32) + b_lv         # (B, OUT_TOT) f32

    # logvar soft bounding (f32 elementwise; exp goes to EUP)
    lv = max_lv - _softplus(max_lv - lv)
    lv = min_lv + _softplus(lv - min_lv)

    mean_ref[...] = mean          # lane-dense (B, OUT_TOT) stores
    logvar_ref[...] = lv


# ----------------------------------------------------------------------------
# Host-side parameter handling
# ----------------------------------------------------------------------------

def init_gaussian_mlp(key, in_size, out_size, num_layers, ensemble_size, hid_size):
    """Per-decoder, per-member weights in the original (unpacked) mbrl layout."""
    keys = jax.random.split(key, 2 * num_layers + 2)
    layers = []
    cur = in_size
    for l in range(num_layers):
        w = jax.random.normal(keys[2 * l], (ensemble_size, cur, hid_size), jnp.float32) * 0.1
        b = jax.random.normal(keys[2 * l + 1], (ensemble_size, 1, hid_size), jnp.float32) * 0.1
        layers.append((w, b))
        cur = hid_size
    w_out = jax.random.normal(keys[-2], (ensemble_size, hid_size, 2 * out_size), jnp.float32) * 0.1
    b_out = jax.random.normal(keys[-1], (ensemble_size, 1, 2 * out_size), jnp.float32) * 0.1
    min_lv = -10.0 * jnp.ones((1, out_size), jnp.float32)   # mbrl default (learnable param init)
    max_lv = 0.5 * jnp.ones((1, out_size), jnp.float32)     # mbrl default
    return (layers, w_out, b_out, min_lv, max_lv)


def pack_focal_params(dyn_params, rew_params):
    """Pack both decoders + ensemble into fused, MXU-shaped matrices.

    Member-slot order along the packed feature axis: [dyn_0..dyn_{E-1}, rew_0..rew_{E-1}].
    Each member's head output occupies a fixed `out_pad`-lane slot so the packed
    output width is a multiple of 128 (lane-dense stores).
    """
    dyn_layers, dyn_w_out, dyn_b_out, dyn_min, dyn_max = dyn_params
    rew_layers, rew_w_out, rew_b_out, rew_min, rew_max = rew_params
    E = dyn_w_out.shape[0]
    hid = dyn_w_out.shape[1]
    num_layers = len(dyn_layers)
    d_in = dyn_layers[0][0].shape[1]
    n_members = 2 * E
    h_tot = n_members * hid

    member_layers = []   # per member: list over layers of (w, b)
    member_heads = []    # per member: (w_out, b_out, out_size, min_lv, max_lv)
    for e in range(E):
        member_layers.append([(w[e], b[e, 0]) for (w, b) in dyn_layers])
        member_heads.append((dyn_w_out[e], dyn_b_out[e, 0],
                             dyn_w_out.shape[-1] // 2, dyn_min[0], dyn_max[0]))
    for e in range(E):
        member_layers.append([(w[e], b[e, 0]) for (w, b) in rew_layers])
        member_heads.append((rew_w_out[e], rew_b_out[e, 0],
                             rew_w_out.shape[-1] // 2, rew_min[0], rew_max[0]))

    # per-member output slot width so the total is lane-dense (multiple of 128)
    max_out = max(h[2] for h in member_heads)
    out_pad = max(max_out, -(-128 // n_members))
    out_tot = -(-(n_members * out_pad) // 128) * 128
    out_pad = out_tot // n_members

    packed_layers = []
    # layer 0: concat along output dim -> (d_in, h_tot)
    w0 = jnp.concatenate([ml[0][0] for ml in member_layers], axis=-1)
    b0 = jnp.concatenate([ml[0][1] for ml in member_layers], axis=-1)[None, :]
    packed_layers.append((w0, b0))
    # layers 1..L-1: block-diagonal (h_tot, h_tot)
    for l in range(1, num_layers):
        w = jnp.zeros((h_tot, h_tot), jnp.float32)
        bs = []
        for m in range(n_members):
            wm, bm = member_layers[m][l]
            w = w.at[m * hid:(m + 1) * hid, m * hid:(m + 1) * hid].set(wm)
            bs.append(bm)
        packed_layers.append((w, jnp.concatenate(bs, axis=-1)[None, :]))

    # heads: block-diagonal, mean / logvar split into separate matrices
    w_mean = jnp.zeros((h_tot, out_tot), jnp.float32)
    w_lv = jnp.zeros((h_tot, out_tot), jnp.float32)
    b_mean = jnp.zeros((1, out_tot), jnp.float32)
    b_lv = jnp.zeros((1, out_tot), jnp.float32)
    min_lv = jnp.full((1, out_tot), -10.0, jnp.float32)   # pad lanes get benign defaults
    max_lv = jnp.full((1, out_tot), 0.5, jnp.float32)
    for m, (w_o, b_o, osz, mn, mx) in enumerate(member_heads):
        r0, c0 = m * hid, m * out_pad
        w_mean = w_mean.at[r0:r0 + hid, c0:c0 + osz].set(w_o[:, :osz])
        w_lv = w_lv.at[r0:r0 + hid, c0:c0 + osz].set(w_o[:, osz:])
        b_mean = b_mean.at[0, c0:c0 + osz].set(b_o[:osz])
        b_lv = b_lv.at[0, c0:c0 + osz].set(b_o[osz:])
        min_lv = min_lv.at[0, c0:c0 + osz].set(mn)
        max_lv = max_lv.at[0, c0:c0 + osz].set(mx)

    meta = dict(num_layers=num_layers, ensemble_size=E, hid=hid, d_in=d_in,
                out_pad=out_pad, out_tot=out_tot,
                dyn_out=dyn_w_out.shape[-1] // 2, rew_out=rew_w_out.shape[-1] // 2)
    packed = dict(layers=packed_layers, w_mean=w_mean, b_mean=b_mean,
                  w_lv=w_lv, b_lv=b_lv, min_lv=min_lv, max_lv=max_lv)
    return packed, meta


# ----------------------------------------------------------------------------
# Forward wrapper
# ----------------------------------------------------------------------------

def focal_decoder_forward(packed, meta, task_embedding, state, action):
    # input_tensor = cat((task_embedding, state, action), -1), shared across ensemble
    x = jnp.concatenate([task_embedding, state, action], axis=-1)
    batch = x.shape[0]
    E = meta["ensemble_size"]
    out_pad, out_tot = meta["out_pad"], meta["out_tot"]
    n_members = 2 * E

    # bf16 matmul operands, f32 biases / logvar bounds, f32 accumulation
    args = [x.astype(jnp.bfloat16)]
    for w, b in packed["layers"]:
        args += [w.astype(jnp.bfloat16), b]
    args += [packed["w_mean"].astype(jnp.bfloat16), packed["b_mean"],
             packed["w_lv"].astype(jnp.bfloat16), packed["b_lv"],
             packed["min_lv"], packed["max_lv"]]

    out_shape = [jax.ShapeDtypeStruct((batch, out_tot), jnp.float32),
                 jax.ShapeDtypeStruct((batch, out_tot), jnp.float32)]

    kernel = functools.partial(_focal_decoder_kernel, meta["num_layers"])
    # Grid-free call: all (tiny) weights and activations fit in VMEM on every
    # TPU generation, so full arrays are mapped as single blocks — no pipeline
    # prologue/epilogue, one launch for both decoders and all ensemble members.
    mean_p, lv_p = pl.pallas_call(kernel, out_shape=out_shape)(*args)

    # Unpack the lane-dense (B, n_members*out_pad) buffers into the module's outputs.
    def unslot(p):
        p = p[:, :n_members * out_pad].reshape(batch, n_members, out_pad)
        return jnp.transpose(p, (1, 0, 2))                    # (n_members, B, out_pad)

    mean_all, lv_all = unslot(mean_p), unslot(lv_p)
    mean_s = mean_all[:E, :, :meta["dyn_out"]]
    logvar_s = lv_all[:E, :, :meta["dyn_out"]]
    mean_r = mean_all[E:, :, :meta["rew_out"]]
    logvar_r = lv_all[E:, :, :meta["rew_out"]]

    sq = lambda t: jnp.squeeze(t, axis=0) if t.shape[0] == 1 else t  # torch .squeeze(0)
    return sq(mean_s), sq(logvar_s), sq(mean_r), sq(logvar_r)


# ----------------------------------------------------------------------------
# Pure-JAX reference (f32, unpacked weights)
# ----------------------------------------------------------------------------

def _ref_gaussian_mlp(x, layers, w_out, b_out, min_lv, max_lv):
    e = w_out.shape[0]
    h = jnp.broadcast_to(x[None], (e,) + x.shape)
    for w, b in layers:
        h = jnp.maximum(jnp.einsum("ebd,edh->ebh", h, w) + b, 0.0)
    y = jnp.einsum("ebd,edh->ebh", h, w_out) + b_out
    out = w_out.shape[-1] // 2
    mean, logvar = y[..., :out], y[..., out:]
    logvar = max_lv - _softplus(max_lv - logvar)
    logvar = min_lv + _softplus(logvar - min_lv)
    return mean, logvar


if __name__ == "__main__":
    # small sizes consistent with the module
    obs_size = 5
    action_size = 3
    task_embedding_size = 8   # task_embedd_is_deterministic = False
    num_layers = 2
    ensemble_size = 2
    hidden_size = 32
    batch = 8
    input_size = obs_size + action_size + task_embedding_size  # 16

    key = jax.random.PRNGKey(0)
    k_dyn, k_rew, k_z, k_s, k_a = jax.random.split(key, 5)

    dyn_params = init_gaussian_mlp(k_dyn, input_size, obs_size, num_layers, ensemble_size, hidden_size)
    rew_params = init_gaussian_mlp(k_rew, input_size, 1, num_layers, ensemble_size, hidden_size)
    packed, meta = pack_focal_params(dyn_params, rew_params)

    task_embedding = jax.random.normal(k_z, (batch, task_embedding_size), jnp.float32)
    state = jax.random.normal(k_s, (batch, obs_size), jnp.float32)
    action = jax.random.normal(k_a, (batch, action_size), jnp.float32)

    fwd = jax.jit(functools.partial(focal_decoder_forward, packed, meta))
    outs = jax.block_until_ready(fwd(task_embedding, state, action))
    mean_s, logvar_s, mean_r, logvar_r = outs

    # pure-JAX f32 reference check (kernel uses bf16 matmul operands -> loose tol)
    x = jnp.concatenate([task_embedding, state, action], axis=-1)
    ref_ms, ref_ls = _ref_gaussian_mlp(x, *dyn_params)
    ref_mr, ref_lr = _ref_gaussian_mlp(x, *rew_params)
    assert mean_s.shape == (ensemble_size, batch, obs_size)
    assert logvar_s.shape == (ensemble_size, batch, obs_size)
    assert mean_r.shape == (ensemble_size, batch, 1)
    assert logvar_r.shape == (ensemble_size, batch, 1)
    tol = dict(atol=3e-2, rtol=3e-2)
    assert jnp.allclose(mean_s, ref_ms, **tol), "mean_state mismatch"
    assert jnp.allclose(logvar_s, ref_ls, **tol), "logvar_state mismatch"
    assert jnp.allclose(mean_r, ref_mr, **tol), "mean_reward mismatch"
    assert jnp.allclose(logvar_r, ref_lr, **tol), "logvar_reward mismatch"

    print("KERNEL_OK")
</pallas_src>

<mosaic_0001>
module attributes {stable_mosaic.version = 11 : i64} {
  func.func @_focal_decoder_kernel(%arg0: memref<8x16xbf16, #tpu.memory_space<vmem>>, %arg1: memref<16x128xbf16, #tpu.memory_space<vmem>>, %arg2: memref<1x128xf32, #tpu.memory_space<vmem>>, %arg3: memref<128x128xbf16, #tpu.memory_space<vmem>>, %arg4: memref<1x128xf32, #tpu.memory_space<vmem>>, %arg5: memref<128x128xbf16, #tpu.memory_space<vmem>>, %arg6: memref<1x128xf32, #tpu.memory_space<vmem>>, %arg7: memref<128x128xbf16, #tpu.memory_space<vmem>>, %arg8: memref<1x128xf32, #tpu.memory_space<vmem>>, %arg9: memref<1x128xf32, #tpu.memory_space<vmem>>, %arg10: memref<1x128xf32, #tpu.memory_space<vmem>>, %arg11: memref<8x128xf32, #tpu.memory_space<vmem>>, %arg12: memref<8x128xf32, #tpu.memory_space<vmem>>) attributes {dimension_semantics = [], scalar_prefetch = 0 : i64, scratch_operands = 0 : i64, tpu.core_type = #tpu.core_type<tc>} {
    %c0 = arith.constant 0 : index
    %c0_0 = arith.constant 0 : index
    %0 = vector.load %arg0[%c0, %c0_0] : memref<8x16xbf16, #tpu.memory_space<vmem>>, vector<8x16xbf16>
    %c0_1 = arith.constant 0 : index
    %c0_2 = arith.constant 0 : index
    %1 = vector.load %arg1[%c0_1, %c0_2] : memref<16x128xbf16, #tpu.memory_space<vmem>>, vector<16x128xbf16>
    %c0_3 = arith.constant 0 : index
    %c0_4 = arith.constant 0 : index
    %2 = vector.load %arg2[%c0_3, %c0_4] : memref<1x128xf32, #tpu.memory_space<vmem>>, vector<1x128xf32>
    %cst = arith.constant dense<0.000000e+00> : vector<8x128xf32>
    %3 = tpu.matmul %0, %1, %cst {dimension_numbers = #tpu.dot_dimension_numbers<[1], [0], [0], [1], [0, 0, 1, 1], [], []>} : vector<8x16xbf16>, vector<16x128xbf16>, vector<8x128xf32> -> vector<8x128xf32>
    %4 = vector.broadcast %2 : vector<1x128xf32> to vector<8x128xf32>
    %5 = arith.addf %3, %4 : vector<8x128xf32>
    %cst_5 = arith.constant 0.000000e+00 : f32
    %6 = vector.broadcast %cst_5 : f32 to vector<8x128xf32>
    %7 = arith.maximumf %5, %6 : vector<8x128xf32>
    %8 = arith.truncf %7 : vector<8x128xf32> to vector<8x128xbf16>
    %c0_6 = arith.constant 0 : index
    %c0_7 = arith.constant 0 : index
    %9 = vector.load %arg3[%c0_6, %c0_7] : memref<128x128xbf16, #tpu.memory_space<vmem>>, vector<128x128xbf16>
    %c0_8 = arith.constant 0 : index
    %c0_9 = arith.constant 0 : index
    %10 = vector.load %arg4[%c0_8, %c0_9] : memref<1x128xf32, #tpu.memory_space<vmem>>, vector<1x128xf32>
    %cst_10 = arith.constant dense<0.000000e+00> : vector<8x128xf32>
    %11 = tpu.matmul %8, %9, %cst_10 {dimension_numbers = #tpu.dot_dimension_numbers<[1], [0], [0], [1], [0, 0, 1, 1], [], []>} : vector<8x128xbf16>, vector<128x128xbf16>, vector<8x128xf32> -> vector<8x128xf32>
    %12 = vector.broadcast %10 : vector<1x128xf32> to vector<8x128xf32>
    %13 = arith.addf %11, %12 : vector<8x128xf32>
    %cst_11 = arith.constant 0.000000e+00 : f32
    %14 = vector.broadcast %cst_11 : f32 to vector<8x128xf32>
    %15 = arith.maximumf %13, %14 : vector<8x128xf32>
    %16 = arith.truncf %15 : vector<8x128xf32> to vector<8x128xbf16>
    %c0_12 = arith.constant 0 : index
    %c0_13 = arith.constant 0 : index
    %17 = vector.load %arg5[%c0_12, %c0_13] : memref<128x128xbf16, #tpu.memory_space<vmem>>, vector<128x128xbf16>
    %c0_14 = arith.constant 0 : index
    %c0_15 = arith.constant 0 : index
    %18 = vector.load %arg6[%c0_14, %c0_15] : memref<1x128xf32, #tpu.memory_space<vmem>>, vector<1x128xf32>
    %c0_16 = arith.constant 0 : index
    %c0_17 = arith.constant 0 : index
    %19 = vector.load %arg7[%c0_16, %c0_17] : memref<128x128xbf16, #tpu.memory_space<vmem>>, vector<128x128xbf16>
    %c0_18 = arith.constant 0 : index
    %c0_19 = arith.constant 0 : index
    %20 = vector.load %arg8[%c0_18, %c0_19] : memref<1x128xf32, #tpu.memory_space<vmem>>, vector<1x128xf32>
    %c0_20 = arith.constant 0 : index
    %c0_21 = arith.constant 0 : index
    %21 = vector.load %arg9[%c0_20, %c0_21] : memref<1x128xf32, #tpu.memory_space<vmem>>, vector<1x128xf32>
    %c0_22 = arith.constant 0 : index
    %c0_23 = arith.constant 0 : index
    %22 = vector.load %arg10[%c0_22, %c0_23] : memref<1x128xf32, #tpu.memory_space<vmem>>, vector<1x128xf32>
    %cst_24 = arith.constant dense<0.000000e+00> : vector<8x128xf32>
    %23 = tpu.matmul %16, %17, %cst_24 {dimension_numbers = #tpu.dot_dimension_numbers<[1], [0], [0], [1], [0, 0, 1, 1], [], []>} : vector<8x128xbf16>, vector<128x128xbf16>, vector<8x128xf32> -> vector<8x128xf32>
    %24 = vector.broadcast %18 : vector<1x128xf32> to vector<8x128xf32>
    %25 = arith.addf %23, %24 : vector<8x128xf32>
    %cst_25 = arith.constant dense<0.000000e+00> : vector<8x128xf32>
    %26 = tpu.matmul %16, %19, %cst_25 {dimension_numbers = #tpu.dot_dimension_numbers<[1], [0], [0], [1], [0, 0, 1, 1], [], []>} : vector<8x128xbf16>, vector<128x128xbf16>, vector<8x128xf32> -> vector<8x128xf32>
    %27 = vector.broadcast %20 : vector<1x128xf32> to vector<8x128xf32>
    %28 = arith.addf %26, %27 : vector<8x128xf32>
    %29 = vector.broadcast %22 : vector<1x128xf32> to vector<8x128xf32>
    %30 = arith.subf %29, %28 : vector<8x128xf32>
    %cst_26 = arith.constant 0.000000e+00 : f32
    %31 = vector.broadcast %cst_26 : f32 to vector<8x128xf32>
    %32 = arith.maximumf %30, %31 : vector<8x128xf32>
    %33 = math.absf %30 : vector<8x128xf32>
    %cst_27 = arith.constant 0.000000e+00 : f32
    %34 = vector.broadcast %cst_27 : f32 to vector<8x128xf32>
    %35 = arith.subf %34, %33 : vector<8x128xf32>
    %36 = math.exp %35 : vector<8x128xf32>
    %37 = math.log1p %36 : vector<8x128xf32>
    %38 = arith.addf %32, %37 : vector<8x128xf32>
    %39 = vector.broadcast %22 : vector<1x128xf32> to vector<8x128xf32>
    %40 = arith.subf %39, %38 : vector<8x128xf32>
    %41 = vector.broadcast %21 : vector<1x128xf32> to vector<8x128xf32>
    %42 = arith.subf %40, %41 : vector<8x128xf32>
    %cst_28 = arith.constant 0.000000e+00 : f32
    %43 = vector.broadcast %cst_28 : f32 to vector<8x128xf32>
    %44 = arith.maximumf %42, %43 : vector<8x128xf32>
    %45 = math.absf %42 : vector<8x128xf32>
    %cst_29 = arith.constant 0.000000e+00 : f32
    %46 = vector.broadcast %cst_29 : f32 to vector<8x128xf32>
    %47 = arith.subf %46, %45 : vector<8x128xf32>
    %48 = math.exp %47 : vector<8x128xf32>
    %49 = math.log1p %48 : vector<8x128xf32>
    %50 = arith.addf %44, %49 : vector<8x128xf32>
    %51 = vector.broadcast %21 : vector<1x128xf32> to vector<8x128xf32>
    %52 = arith.addf %51, %50 : vector<8x128xf32>
    %c0_30 = arith.constant 0 : index
    %c0_31 = arith.constant 0 : index
    %53 = vector.load %arg11[%c0_30, %c0_31] : memref<8x128xf32, #tpu.memory_space<vmem>>, vector<8x128xf32>
    tpu.vector_store %arg11[%c0_30, %c0_31], %25 {strides = array<i32>} : memref<8x128xf32, #tpu.memory_space<vmem>>, vector<8x128xf32>,
    %c0_32 = arith.constant 0 : index
    %c0_33 = arith.constant 0 : index
    %54 = vector.load %arg12[%c0_32, %c0_33] : memref<8x128xf32, #tpu.memory_space<vmem>>, vector<8x128xf32>
    tpu.vector_store %arg12[%c0_32, %c0_33], %52 {strides = array<i32>} : memref<8x128xf32, #tpu.memory_space<vmem>>, vector<8x128xf32>,
    return
  }
}

</mosaic_0001>

<bundles_post_ra>
// kernel: focal_decoder_forward.1
= control target key start
LH: loop header
LB: loop body
LE: loop exit
PB: predicated region body
PF: predicated region fallthrough
CT: control target
= control target key end

     0   :  { %18 = vsyncpa [#allocation3], 0  ;;  %s749_s0 = inlined_call_operand.vmem [shape: bf16[8,16], index: 0, kind: input, shape index: {}]   ;;  %s750_s1 = inlined_call_operand.vmem [shape: bf16[16,128], index: 1, kind: input, shape index: {}]   ;;  %s751_s2 = inlined_call_operand.vmem [shape: f32[1,128], index: 2, kind: input, shape index: {}]   ;;  %s752_s3 = inlined_call_operand.hbm [shape: bf16[128,128], index: 3, kind: input, shape index: {}]   ;;  %s753_s4 = inlined_call_operand.vmem [shape: f32[1,128], index: 4, kind: input, shape index: {}]   ;;  %s754_s5 = inlined_call_operand.hbm [shape: bf16[128,128], index: 5, kind: input, shape index: {}]   ;;  %s755_s6 = inlined_call_operand.vmem [shape: f32[1,128], index: 6, kind: input, shape index: {}]   ;;  %s756_s7 = inlined_call_operand.hbm [shape: bf16[128,128], index: 7, kind: input, shape index: {}]   ;;  %s757_s8 = inlined_call_operand.vmem [shape: f32[1,128], index: 8, kind: input, shape index: {}]   ;;  %s758_s9 = inlined_call_operand.vmem [shape: f32[1,128], index: 9, kind: input, shape index: {}]   ;;  %s759_s10 = inlined_call_operand.vmem [shape: f32[1,128], index: 10, kind: input, shape index: {}]   ;;  %s760_s11 = inlined_call_operand.vmem [shape: f32[8,128], index: 11, kind: output, shape index: {0}]   ;;  %s761_s12 = inlined_call_operand.vmem [shape: f32[8,128], index: 12, kind: output, shape index: {1}]  }
   0x1   :  { %19 = vsyncpa [#allocation5], 0  ;;  %s45_s23 = sshll.u32 %s754_s5, 4  ;;  %s640_s24 = smov [#allocation4]   ;;  %s46_s23 = int_to_ptr.hbm [resolvable:$true] %s45_s23 }
   0x2   :  { %s47_s25 = sshll.u32 %s640_s24, 4  ;;  %s30_s28 = sshll.u32 %s752_s3, 4  ;;  %s48_s25 = int_to_ptr.vmem [resolvable:$true] %s47_s25  ;;  %s31_s28 = int_to_ptr.hbm [resolvable:$true] %s30_s28 }
   0x3   :  { %s641_s29 = smov 64   ;;  %s642_s30 = smov 4  }
   0x4   :  { %53 = dma.hbm_to_vmem [thread:$0]  %s46_s23, 1024, %s48_s25, [#allocation5], %s641_s29, %s641_s29, %s642_s30  }
   0x5   :  { %s643_s13 = smov [#allocation2]   ;;  %s60_s17 = sshll.u32 %s756_s7, 4  ;;  %s61_s17 = int_to_ptr.hbm [resolvable:$true] %s60_s17 }
   0x6   :  { %s32_s14 = sshll.u32 %s643_s13, 4  ;;  %s644_s5 = smov [#allocation6]   ;;  %s33_s14 = int_to_ptr.vmem [resolvable:$true] %s32_s14 }
   0x7   :  { %38 = dma.hbm_to_vmem [thread:$0]  %s31_s28, 1024, %s33_s14, [#allocation3], %s641_s29, %s641_s29, %s642_s30  }
   0x8   :  { %s62_s18 = sshll.u32 %s644_s5, 4  ;;  %s63_s18 = int_to_ptr.vmem [resolvable:$true] %s62_s18 }
   0x9   :  { %68 = dma.hbm_to_vmem [thread:$0]  %s61_s17, 1024, %s63_s18, [#allocation5], %s641_s29, %s641_s29, %s642_s30  }
   0xa   :  { %636 = dma.done.wait [#allocation3], 1024  }
   0xb   :  { %637 = vsyncadd [#allocation3], 4294966272 }
   0xc   :  { %638 = dma.done.wait [#allocation5], 2048  }
   0xd   :  { %639 = vsyncadd [#allocation5], 4294965248  ;;  %v520_v0 = vld [vmem:[%s750_s1] sm:$0xff]  ;;  %v528_v1 = vld [vmem:[#allocation2 + $0x38] sm:$0xff]  ;;  %vm101_vm0 = vcmask 130048  }
   0xe   :  { %112 = vmatpush.bf16.msra.mxu0 %v520_v0  ;;  %v88_v2 = vld [vmem:[%s749_s0] sm:$0xf]  ;;  %188 = vmatpush.bf16.msra.mxu1 %v528_v1  ;;  %v527_v3 = vld [vmem:[#allocation2 + $0x30] sm:$0xff]  ;;  %v526_v4 = vld [vmem:[#allocation2 + $0x28] sm:$0xff] }
   0xf   :  { %v525_v5 = vld [vmem:[#allocation2 + $0x20] sm:$0xff]  ;;  %v524_v6 = vld [vmem:[#allocation2 + $0x18] sm:$0xff]  ;;  %v523_v7 = vld [vmem:[#allocation2 + $0x10] sm:$0xff] }
  0x10   :  { %v522_v8 = vld [vmem:[#allocation2 + $0x8] sm:$0xff]  ;;  %v521_v9 = vld [vmem:[#allocation2] sm:$0xff]  ;;  %v536_v10 = vld [vmem:[#allocation4 + $0x38] sm:$0xff] }
  0x11   :  { %423 = vmatmul.msk.bf16.vlgmr.msra.gmra.mxu0 %vm101_vm0, %v88_v2  ;;  %v544_v11 = vld [vmem:[#allocation6 + $0x38] sm:$0xff]  ;;  %290 = vmatpush.bf16.msra.mxu2 %v536_v10  ;;  %v535_v12 = vld [vmem:[#allocation4 + $0x30] sm:$0xff]  ;;  %v534_v14 = vld [vmem:[#allocation4 + $0x28] sm:$0xff] }
  0x12   :  { %189 = vmatpush.bf16.msra.mxu1 %v527_v3  ;;  %354 = vmatpush.bf16.msra.mxu3 %v544_v11  ;;  %v543_v13 = vld [vmem:[#allocation6 + $0x30] sm:$0xff]  ;;  %v542_v15 = vld [vmem:[#allocation6 + $0x28] sm:$0xff]  ;;  %v533_v16 = vld [vmem:[#allocation4 + $0x20] sm:$0xff] }
  0x13   :  { %v541_v17 = vld [vmem:[#allocation6 + $0x20] sm:$0xff]  ;;  %v532_v18 = vld [vmem:[#allocation4 + $0x18] sm:$0xff]  ;;  %v531_v20 = vld [vmem:[#allocation4 + $0x10] sm:$0xff] }
  0x14   :  { %v540_v19 = vld [vmem:[#allocation6 + $0x18] sm:$0xff]  ;;  %v539_v21 = vld [vmem:[#allocation6 + $0x10] sm:$0xff]  ;;  %v550_v22 = vld [vmem:[%s751_s2] ss:$0 sm:$0xff] }
  0x15   :  { %291 = vmatpush.bf16.msra.mxu2 %v535_v12  ;;  %v530_v28 = vld [vmem:[#allocation4 + $0x8] sm:$0xff]  ;;  %v529_v30 = vld [vmem:[#allocation4] sm:$0xff] }
  0x16   :  { %190 = vmatpush.bf16.msra.mxu1 %v526_v4  ;;  %355 = vmatpush.bf16.msra.mxu3 %v543_v13  ;;  %v538_v29 = vld [vmem:[#allocation6 + $0x8] sm:$0xff]  ;;  %v537_v31 = vld [vmem:[#allocation6] sm:$0xff] }
  0x17   :  { %v551_v32 = vld [vmem:[%s753_s4] ss:$0 sm:$0xff] }
  0x18   :  { %v552_v38 = vld [vmem:[%s755_s6] ss:$0 sm:$0xff] }
  0x19   :  { %292 = vmatpush.bf16.msra.mxu2 %v534_v14  ;;  %v553_v39 = vld [vmem:[%s757_s8] ss:$0 sm:$0xff] }
  0x1a   :  { %191 = vmatpush.bf16.msra.mxu1 %v525_v5  ;;  %356 = vmatpush.bf16.msra.mxu3 %v542_v15  ;;  %v554_v40 = vld [vmem:[%s759_s10] ss:$0 sm:$0xff] }
  0x1b   :  { %v555_v62 = vld [vmem:[%s758_s9] ss:$0 sm:$0xff] }
  0x1d   :  { %293 = vmatpush.bf16.msra.mxu2 %v533_v16 }
  0x1e   :  { %192 = vmatpush.bf16.msra.mxu1 %v524_v6  ;;  %357 = vmatpush.bf16.msra.mxu3 %v541_v17 }
  0x21   :  { %294 = vmatpush.bf16.msra.mxu2 %v532_v18 }
  0x22   :  { %193 = vmatpush.bf16.msra.mxu1 %v523_v7  ;;  %358 = vmatpush.bf16.msra.mxu3 %v540_v19 }
  0x25   :  { %295 = vmatpush.bf16.msra.mxu2 %v531_v20 }
  0x26   :  { %194 = vmatpush.bf16.msra.mxu1 %v522_v8  ;;  %359 = vmatpush.bf16.msra.mxu3 %v539_v21 }
  0x29   :  { %296 = vmatpush.bf16.msra.mxu2 %v530_v28 }
  0x2a   :  { %195 = vmatpush.bf16.msra.mxu1 %v521_v9  ;;  %360 = vmatpush.bf16.msra.mxu3 %v538_v29 }
  0x2d   :  { %297 = vmatpush.bf16.msra.mxu2 %v529_v30 }
  0x2e   :  { %361 = vmatpush.bf16.msra.mxu3 %v537_v31 }
  0x8e   :  { %v114_v23 = vpop.f32.mrf.mxu0 }
  0x8f   :  { %v115_v24 = vadd.f32 %v550_v22, %v114_v23 }
  0x91   :  { %v118_v25 = vmax.f32 %v115_v24, 0.0 }
  0x93   :  { %v119_v26 = vpack.c.bf16 %v118_v25, %v118_v25 }
  0x95   :  { %196 = vmatmul.bf16.vlgmr.msra.gmra.mxu1 %v119_v26 }
  0x96   :  { %v116_v27 = vpop.f32.mrf.mxu0 }
 0x112   :  { %v197_v33 = vpop.f32.mrf.mxu1 }
 0x113   :  { %v198_v34 = vadd.f32 %v551_v32, %v197_v33 }
 0x115   :  { %v201_v35 = vmax.f32 %v198_v34, 0.0 }
 0x117   :  { %v202_v36 = vpack.c.bf16 %v201_v35, %v201_v35 }
 0x119   :  { %298 = vmatmul.bf16.vlgmr.msra.gmra.mxu2 %v202_v36  ;;  %362 = vmatmul.bf16.vlgmr.msra.gmra.mxu3 %v202_v36 }
 0x11a   :  { %v199_v37 = vpop.f32.mrf.mxu1 }
 0x19c   :  { %v299_v41 = vpop.f32.mrf.mxu2  ;;  %v363_v42 = vpop.f32.mrf.mxu3 }
 0x19d   :  { %v300_v43 = vadd.f32 %v552_v38, %v299_v41  ;;  %v364_v44 = vadd.f32 %v553_v39, %v363_v42 }
 0x19f   :  { %407 = vst [vmem:[%s760_s11] sm:$0xff] %v300_v43  ;;  %v370_v45 = vsub.f32 %v554_v40, %v364_v44 }
 0x1a1   :  { %v372_v46 = vand.u32 2147483647, %v370_v45  ;;  %v371_v59 = vmax.f32 %v370_v45, 0.0 }
 0x1a3   :  { %v373_v47 = vsub.f32 0.0, %v372_v46 }
 0x1a4   :  { %v301_v48 = vpop.f32.mrf.mxu2  ;;  %v365_v49 = vpop.f32.mrf.mxu3 }
 0x1a5   :  { %v374_v50 = vmul.f32 1.442695, %v373_v47 }
 0x1a7   :  { %556 = vpow2.f32 %v374_v50 }
 0x1ad   :  { %v557_v51 = vpop.eup %556 }
 0x1ae   :  { %v376_v52 = vadd.f32 1.0, %v557_v51  ;;  %v379_v53 = vmul.f32 -0.5, %v557_v51  ;;  %v382_v55 = vand.u32 2147483647, %v557_v51 }
 0x1b0   :  { %558 = vlog2.f32 %v376_v52  ;;  %v380_v54 = vadd.f32 1.0, %v379_v53  ;;  %vm383_vm1 = vcmp.lt.f32.partialorder %v382_v55, 0.0004427343 }
 0x1b2   :  { %v381_v58 = vmul.f32 %v557_v51, %v380_v54 }
 0x1b6   :  { %v559_v56 = vpop.eup %558 }
 0x1b7   :  { %v378_v57 = vmul.f32 0.6931472, %v559_v56 }
 0x1b9   :  { %v384_v60 = vsel %vm383_vm1, %v381_v58, %v378_v57 }
 0x1ba   :  { %v385_v61 = vadd.f32 %v384_v60, %v371_v59 }
 0x1bc   :  { %v386_v63 = vsub.f32 %v554_v40, %v385_v61 }
 0x1be   :  { %v390_v0 = vsub.f32 %v386_v63, %v555_v62 }
 0x1c0   :  { %v392_v1 = vand.u32 2147483647, %v390_v0  ;;  %v391_v12 = vmax.f32 %v390_v0, 0.0 }
 0x1c2   :  { %v393_v2 = vsub.f32 0.0, %v392_v1 }
 0x1c4   :  { %v394_v3 = vmul.f32 1.442695, %v393_v2 }
 0x1c6   :  { %560 = vpow2.f32 %v394_v3 }
 0x1cc   :  { %v561_v4 = vpop.eup %560 }
 0x1cd   :  { %v396_v5 = vadd.f32 1.0, %v561_v4  ;;  %v399_v6 = vmul.f32 -0.5, %v561_v4  ;;  %v402_v8 = vand.u32 2147483647, %v561_v4 }
 0x1cf   :  { %562 = vlog2.f32 %v396_v5  ;;  %v400_v7 = vadd.f32 1.0, %v399_v6  ;;  %vm403_vm2 = vcmp.lt.f32.partialorder %v402_v8, 0.0004427343 }
 0x1d1   :  { %v401_v11 = vmul.f32 %v561_v4, %v400_v7 }
 0x1d5   :  { %v563_v9 = vpop.eup %562 }
 0x1d6   :  { %v398_v10 = vmul.f32 0.6931472, %v563_v9 }
 0x1d8   :  { %v404_v13 = vsel %vm403_vm2, %v401_v11, %v398_v10 }
 0x1d9   :  { %v405_v14 = vadd.f32 %v404_v13, %v391_v12 }
 0x1db   :  { %v406_v15 = vadd.f32 %v555_v62, %v405_v14 }
 0x1dd   :  { %408 = vst [vmem:[%s761_s12] sm:$0xff] %v406_v15 }
 0x1de   :  { %417 = vsyncpa [#allocation3], 1 }
 0x1df   :  { %418 = vsyncpa [#allocation5], 1 }

</bundles_post_ra>
